<compile_context>
chip_gen: v5e
topology: v5e:2x2
jax: 0.10.0
libtpu: 0.0.40
codegen_flags: <defaults>
</compile_context>

<pallas_src>
import jax
import jax.numpy as jnp
from jax.experimental import pallas as pl
from jax.experimental.pallas import tpu as pltpu
import numpy as np


# ---------------------------------------------------------------------------
# helpers
# ---------------------------------------------------------------------------
def _ru(n, m):
    return ((n + m - 1) // m) * m


# ---------------------------------------------------------------------------
# Host-side parameter packing: fold fc2 into the LSTM input projection, permute gates,
# fold every bias into a matmul, pad everything into one lane-dense (ROWS, 128) slab.
# ---------------------------------------------------------------------------
def pack_params(params, layer_dims):
    w1, b1, w2, b2, wih, whh, bih, bhh = (np.asarray(p, np.float32) for p in params)
    d0, d1, d2, d3 = layer_dims
    H = d3
    G4 = 4 * H

    # PyTorch gate order (i, f, g, o) -> (i, f, o, g): one sigmoid block + one tanh block.
    perm = np.concatenate([np.arange(0, 2 * H), np.arange(3 * H, 4 * H),
                           np.arange(2 * H, 3 * H)])

    # Fold the second Linear into the LSTM input projection (no nonlinearity between them).
    wih_eff = (w2 @ wih)[:, perm]                     # (d1, 4H)
    whh_p = whh[:, perm]                              # (H , 4H)
    b_eff = (b2 @ wih + bih + bhh)[:, perm]           # (1 , 4H)
    # NOTE: b_eff carries bih + bhh.  This remains valid with the T-step loop in-kernel
    # because b_eff is re-injected through the x-projection at EVERY timestep (ones-column
    # trick below), i.e. each step's gates get the full bias exactly once.

    # Slab width must cover the fc1 output width (d1 real cols + 1 "ones" col) and the
    # 4H gate width, rounded to full 128-lane tiles.
    WS = max(_ru(d1 + 1, 128), _ru(G4, 128))

    OFF_W1 = 0                      # (d0, WS)  fc1 weight; cols >= d1 stay exactly 0
    OFF_B1 = _ru(d0, 8)             # (1 , WS)  fc1 bias; col d1 == 1.0 (ones column)
    OFF_WX = OFF_B1 + 8             # (WS, WS)  fused x->gates weight; row d1 == b_eff
    OFF_WH = OFF_WX + WS            # (H , WS)  recurrent weight (permuted whh)
    ROWS = OFF_WH + _ru(H, 8)

    slab = np.zeros((ROWS, WS), np.float32)
    slab[OFF_W1:OFF_W1 + d0, :d1] = w1
    slab[OFF_B1, :d1] = b1[0]
    slab[OFF_B1, d1] = 1.0                            # -> h1[:, d1] == ReLU(1) == 1
    slab[OFF_WX:OFF_WX + d1, :G4] = wih_eff
    slab[OFF_WX + d1, :G4] = b_eff[0]                 # gate bias folded into the matmul
    slab[OFF_WH:OFF_WH + H, :G4] = whh_p

    # Fragility guards (review correctness concern): the bias fold / gate matmul rely on
    # these paddings being exactly zero and on ReLU(0) == 0, ReLU(1) == 1.
    assert WS > d1
    assert np.all(slab[OFF_W1:OFF_W1 + d0, d1:] == 0.0)
    assert np.all(slab[OFF_B1, d1 + 1:] == 0.0)
    assert np.all(slab[OFF_WX + d1 + 1:OFF_WX + WS, :] == 0.0)

    layout = dict(D0=d0, D1=d1, H=H, G4=G4, WS=WS, ROWS=ROWS,
                  OFF_W1=OFF_W1, OFF_B1=OFF_B1, OFF_WX=OFF_WX, OFF_WH=OFF_WH)
    return jnp.asarray(slab), layout


# ---------------------------------------------------------------------------
# Pallas kernel: hoisted fc1+x-projection over all T*B rows, then an in-kernel loop over T
# with only the small recurrent matmul + cell update on the serial dependency chain.
# ---------------------------------------------------------------------------
def _make_kernel(layout, T, B):
    D0, D1, H = layout["D0"], layout["D1"], layout["H"]
    WS = layout["WS"]
    OFF_W1, OFF_B1 = layout["OFF_W1"], layout["OFF_B1"]
    OFF_WX, OFF_WH = layout["OFF_WX"], layout["OFF_WH"]

    def kernel(x_ref, h0_ref, c0_ref, p_ref, hseq_ref, cn_ref, xg_s, h_s, c_s):
        # ---- hoisted, time-batched part: one MXU-friendly (T*B, .) matmul chain ----
        x = x_ref[...]                                          # (T*B, d0)
        w1 = p_ref[OFF_W1:OFF_W1 + D0, :]                       # (d0, WS)
        b1 = p_ref[OFF_B1:OFF_B1 + 1, :]                        # (1 , WS), col D1 == 1.0
        h1 = jnp.maximum(
            jnp.dot(x, w1, preferred_element_type=jnp.float32) + b1, 0.0)
        # h1[:, D1] == 1 exactly and h1[:, D1+1:] == 0, so row D1 of wx (holding the fused
        # gate bias b2@wih + bih + bhh) is added to every timestep's pre-activation for
        # free, and the zero-padded rows of wx contribute nothing.
        wx = p_ref[OFF_WX:OFF_WX + WS, :]                       # (WS, WS)
        xg_s[...] = jnp.dot(h1, wx, preferred_element_type=jnp.float32)   # (T*B, WS)

        # ---- sequential recurrence: only (B,H)@(H,4H) + VPU cell update per step ----
        wh = p_ref[OFF_WH:OFF_WH + H, :]                        # (H, WS), loaded once
        h_s[...] = h0_ref[...]
        c_s[...] = c0_ref[...]

        @pl.loop(0, T)
        def _(t):
            g = xg_s[pl.ds(t * B, B), :] + jnp.dot(
                h_s[...], wh, preferred_element_type=jnp.float32)        # (B, WS)
            # gate order (i, f, o, g): one sigmoid over 3H lanes + one tanh over H lanes.
            sig = jax.nn.sigmoid(g[:, :3 * H])
            g_g = jnp.tanh(g[:, 3 * H:4 * H])
            i_g = sig[:, :H]
            f_g = sig[:, H:2 * H]
            o_g = sig[:, 2 * H:3 * H]
            c = f_g * c_s[...] + i_g * g_g
            h = o_g * jnp.tanh(c)
            c_s[...] = c
            h_s[...] = h
            # Output is tiny (<=8 KiB); a masked 32-lane store here beats paying an extra
            # wrapper-side slice to undo 128-lane padding.
            hseq_ref[pl.ds(t * B, B), :] = h

        cn_ref[...] = c_s[...]

    return kernel


def _run_lstm_kernel(x2d, h0, c0, slab, layout, T):
    """No grid: total footprint ~130 KiB << VMEM on every TPU generation."""
    B, H = h0.shape
    WS, D0 = layout["WS"], layout["D0"]
    TB = T * B
    assert x2d.shape == (TB, D0)

    flops = 2 * TB * D0 * WS + 2 * TB * WS * WS + 2 * T * B * H * WS + 10 * T * B * WS
    bytes_acc = 4 * (x2d.size + h0.size + c0.size + slab.size + TB * H + B * H)
    ce = pl.CostEstimate(flops=int(flops), transcendentals=int(5 * T * B * H),
                         bytes_accessed=int(bytes_acc))

    vmem = pl.BlockSpec(memory_space=pltpu.MemorySpace.VMEM)
    h_seq, c_n = pl.pallas_call(
        _make_kernel(layout, T, B),
        out_shape=(jax.ShapeDtypeStruct((TB, H), jnp.float32),
                   jax.ShapeDtypeStruct((B, H), jnp.float32)),
        in_specs=[vmem, vmem, vmem, vmem],
        out_specs=(vmem, vmem),
        scratch_shapes=[pltpu.VMEM((TB, WS), jnp.float32),   # hoisted x->gates projection
                        pltpu.VMEM((B, H), jnp.float32),     # h carried across timesteps
                        pltpu.VMEM((B, H), jnp.float32)],    # c carried across timesteps
        cost_estimate=ce,
    )(x2d, h0, c0, slab)
    return h_seq, c_n


def lstm_network_forward(x, h0, c0, slab, layout):
    """Module-equivalent forward: fc -> LSTM on a length-1 sequence with state (h0, c0)."""
    h_seq, c_n = _run_lstm_kernel(x, h0, c0, slab, layout, T=1)
    # Module returns (ag_reps.squeeze(0), h_n, c_n); for seq_len == 1, ag_reps == h_n.
    return h_seq, h_seq, c_n


def lstm_network_rollout(x_seq, h0, c0, slab, layout):
    """T timesteps of the same module in ONE kernel launch (weights loaded once).

    x_seq: (T, B, d0). Returns (h_seq (T,B,H), c_T (B,H))."""
    T, B, d0 = x_seq.shape
    h_seq, c_n = _run_lstm_kernel(x_seq.reshape(T * B, d0), h0, c0, slab, layout, T=T)
    return h_seq.reshape(T, B, -1), c_n


# ---------------------------------------------------------------------------
# Deterministic parameter construction (mirrors the PyTorch __init__)
# ---------------------------------------------------------------------------
def _orthogonal(key, out_dim, in_dim):
    """nn.init.orthogonal_ on a (out_dim, in_dim) weight, returned as (in, out)."""
    big, small = max(out_dim, in_dim), min(out_dim, in_dim)
    a = jax.random.normal(key, (big, small), dtype=jnp.float32)
    q, r = jnp.linalg.qr(a)
    q = q * jnp.sign(jnp.diag(r))
    w = q if out_dim >= in_dim else q.T          # (out_dim, in_dim)
    return w.T                                    # (in_dim, out_dim)


def make_params(key, layer_dims):
    d0, d1, d2, d3 = layer_dims
    ks = jax.random.split(key, 6)
    # fc_network (init_ortho=True, zero biases)
    w1 = _orthogonal(ks[0], d1, d0)               # (d0, d1)
    b1 = jnp.zeros((1, d1), jnp.float32)
    w2 = _orthogonal(ks[1], d2, d1)               # (d1, d2)
    b2 = jnp.zeros((1, d2), jnp.float32)
    # nn.LSTM default init: U(-1/sqrt(H), 1/sqrt(H)), gate order i,f,g,o
    H = d3
    k = 1.0 / jnp.sqrt(jnp.float32(H))
    wih = jax.random.uniform(ks[2], (d2, 4 * H), jnp.float32, -k, k)   # (in, 4H)
    whh = jax.random.uniform(ks[3], (H, 4 * H), jnp.float32, -k, k)    # (H, 4H)
    bih = jax.random.uniform(ks[4], (1, 4 * H), jnp.float32, -k, k)
    bhh = jax.random.uniform(ks[5], (1, 4 * H), jnp.float32, -k, k)
    return (w1, b1, w2, b2, wih, whh, bih, bhh)


def reference_forward(x, h0, c0, params):
    """Plain-JAX reference using the ORIGINAL (unfolded, i/f/g/o) parameters."""
    w1, b1, w2, b2, wih, whh, bih, bhh = params
    h1 = jnp.maximum(x @ w1 + b1, 0.0)
    n_out = h1 @ w2 + b2
    gates = n_out @ wih + bih + h0 @ whh + bhh
    H = h0.shape[-1]
    i = jax.nn.sigmoid(gates[:, :H])
    f = jax.nn.sigmoid(gates[:, H:2 * H])
    g = jnp.tanh(gates[:, 2 * H:3 * H])
    o = jax.nn.sigmoid(gates[:, 3 * H:])
    c = f * c0 + i * g
    h = o * jnp.tanh(c)
    return h, h, c


def reference_rollout(x_seq, h0, c0, params):
    hs, h, c = [], h0, c0
    for t in range(x_seq.shape[0]):
        _, h, c = reference_forward(x_seq[t], h, c, params)
        hs.append(h)
    return jnp.stack(hs), h, c


# ---------------------------------------------------------------------------
if __name__ == "__main__":
    layer_dims = [16, 64, 32, 32]   # fc: 16->64->32, LSTM: 32->32
    batch = 8
    seq_len = 8                     # for the in-kernel rollout demo

    key = jax.random.PRNGKey(0)
    k_x, k_h, k_c, k_p = jax.random.split(key, 4)

    x_seq = jax.random.normal(k_x, (seq_len, batch, layer_dims[0]), jnp.float32)
    h0 = jax.random.normal(k_h, (batch, layer_dims[-1]), jnp.float32)
    c0 = jax.random.normal(k_c, (batch, layer_dims[-1]), jnp.float32)

    params = make_params(k_p, layer_dims)
    slab, layout = pack_params(params, layer_dims)

    # --- module-equivalent single-step forward (seq_len == 1) ---
    ag_reps, h_n, c_n = jax.block_until_ready(
        lstm_network_forward(x_seq[0], h0, c0, slab, layout))
    r_ag, r_h, r_c = reference_forward(x_seq[0], h0, c0, params)
    np.testing.assert_allclose(np.asarray(ag_reps), np.asarray(r_ag), rtol=1e-4, atol=1e-4)
    np.testing.assert_allclose(np.asarray(h_n), np.asarray(r_h), rtol=1e-4, atol=1e-4)
    np.testing.assert_allclose(np.asarray(c_n), np.asarray(r_c), rtol=1e-4, atol=1e-4)

    # --- T timesteps inside ONE kernel launch (review item #1/#2) ---
    h_all, c_T = jax.block_until_ready(
        lstm_network_rollout(x_seq, h0, c0, slab, layout))
    r_hs, r_hT, r_cT = reference_rollout(x_seq, h0, c0, params)
    np.testing.assert_allclose(np.asarray(h_all), np.asarray(r_hs), rtol=1e-4, atol=1e-4)
    np.testing.assert_allclose(np.asarray(c_T), np.asarray(r_cT), rtol=1e-4, atol=1e-4)

    print("KERNEL_OK")
</pallas_src>

<mosaic_0001>
module attributes {stable_mosaic.version = 11 : i64} {
  func.func @kernel(%arg0: memref<8x16xf32, #tpu.memory_space<vmem>>, %arg1: memref<8x32xf32, #tpu.memory_space<vmem>>, %arg2: memref<8x32xf32, #tpu.memory_space<vmem>>, %arg3: memref<184x128xf32, #tpu.memory_space<vmem>>, %arg4: memref<8x32xf32, #tpu.memory_space<vmem>>, %arg5: memref<8x32xf32, #tpu.memory_space<vmem>>, %arg6: memref<8x128xf32, #tpu.memory_space<vmem>>, %arg7: memref<8x32xf32, #tpu.memory_space<vmem>>, %arg8: memref<8x32xf32, #tpu.memory_space<vmem>>) attributes {dimension_semantics = [], scalar_prefetch = 0 : i64, scratch_operands = 3 : i64, tpu.core_type = #tpu.core_type<tc>} {
    %c0 = arith.constant 0 : index
    %c0_0 = arith.constant 0 : index
    %0 = vector.load %arg0[%c0, %c0_0] : memref<8x16xf32, #tpu.memory_space<vmem>>, vector<8x16xf32>
    %c0_1 = arith.constant 0 : index
    %c0_2 = arith.constant 0 : index
    %1 = vector.load %arg3[%c0_1, %c0_2] : memref<184x128xf32, #tpu.memory_space<vmem>>, vector<16x128xf32>
    %c16 = arith.constant 16 : index
    %c0_3 = arith.constant 0 : index
    %2 = vector.load %arg3[%c16, %c0_3] : memref<184x128xf32, #tpu.memory_space<vmem>>, vector<1x128xf32>
    %cst = arith.constant dense<0.000000e+00> : vector<8x128xf32>
    %3 = tpu.matmul %0, %1, %cst {dimension_numbers = #tpu.dot_dimension_numbers<[1], [0], [0], [1], [0, 0, 1, 1], [], []>} : vector<8x16xf32>, vector<16x128xf32>, vector<8x128xf32> -> vector<8x128xf32>
    %4 = vector.broadcast %2 : vector<1x128xf32> to vector<8x128xf32>
    %5 = arith.addf %3, %4 : vector<8x128xf32>
    %cst_4 = arith.constant 0.000000e+00 : f32
    %6 = vector.broadcast %cst_4 : f32 to vector<8x128xf32>
    %7 = arith.maximumf %5, %6 : vector<8x128xf32>
    %c24 = arith.constant 24 : index
    %c0_5 = arith.constant 0 : index
    %8 = vector.load %arg3[%c24, %c0_5] : memref<184x128xf32, #tpu.memory_space<vmem>>, vector<128x128xf32>
    %cst_6 = arith.constant dense<0.000000e+00> : vector<8x128xf32>
    %9 = tpu.matmul %7, %8, %cst_6 {dimension_numbers = #tpu.dot_dimension_numbers<[1], [0], [0], [1], [0, 0, 1, 1], [], []>} : vector<8x128xf32>, vector<128x128xf32>, vector<8x128xf32> -> vector<8x128xf32>
    %c0_7 = arith.constant 0 : index
    %c0_8 = arith.constant 0 : index
    %10 = vector.load %arg6[%c0_7, %c0_8] : memref<8x128xf32, #tpu.memory_space<vmem>>, vector<8x128xf32>
    tpu.vector_store %arg6[%c0_7, %c0_8], %9 {strides = array<i32>} : memref<8x128xf32, #tpu.memory_space<vmem>>, vector<8x128xf32>,
    %c152 = arith.constant 152 : index
    %c0_9 = arith.constant 0 : index
    %11 = vector.load %arg3[%c152, %c0_9] : memref<184x128xf32, #tpu.memory_space<vmem>>, vector<32x128xf32>
    %c0_10 = arith.constant 0 : index
    %c0_11 = arith.constant 0 : index
    %12 = vector.load %arg1[%c0_10, %c0_11] : memref<8x32xf32, #tpu.memory_space<vmem>>, vector<8x32xf32>
    %c0_12 = arith.constant 0 : index
    %c0_13 = arith.constant 0 : index
    %13 = vector.load %arg7[%c0_12, %c0_13] : memref<8x32xf32, #tpu.memory_space<vmem>>, vector<8x32xf32>
    tpu.vector_store %arg7[%c0_12, %c0_13], %12 {strides = array<i32>} : memref<8x32xf32, #tpu.memory_space<vmem>>, vector<8x32xf32>,
    %c0_14 = arith.constant 0 : index
    %c0_15 = arith.constant 0 : index
    %14 = vector.load %arg2[%c0_14, %c0_15] : memref<8x32xf32, #tpu.memory_space<vmem>>, vector<8x32xf32>
    %c0_16 = arith.constant 0 : index
    %c0_17 = arith.constant 0 : index
    %15 = vector.load %arg8[%c0_16, %c0_17] : memref<8x32xf32, #tpu.memory_space<vmem>>, vector<8x32xf32>
    tpu.vector_store %arg8[%c0_16, %c0_17], %14 {strides = array<i32>} : memref<8x32xf32, #tpu.memory_space<vmem>>, vector<8x32xf32>,
    %c0_i32 = arith.constant 0 : i32
    %c1_i32 = arith.constant 1 : i32
    %16 = arith.muli %c0_i32, %c1_i32 : i32
    %c0_i32_18 = arith.constant 0 : i32
    %17 = arith.addi %c0_i32_18, %16 : i32
    %c8_i32 = arith.constant 8 : i32
    %18 = arith.muli %17, %c8_i32 : i32
    %19 = arith.index_cast %18 : i32 to index
    %c0_19 = arith.constant 0 : index
    %20 = vector.load %arg6[%19, %c0_19] : memref<8x128xf32, #tpu.memory_space<vmem>>, vector<8x128xf32>
    %c0_20 = arith.constant 0 : index
    %c0_21 = arith.constant 0 : index
    %21 = vector.load %arg7[%c0_20, %c0_21] : memref<8x32xf32, #tpu.memory_space<vmem>>, vector<8x32xf32>
    %cst_22 = arith.constant dense<0.000000e+00> : vector<8x128xf32>
    %22 = tpu.matmul %21, %11, %cst_22 {dimension_numbers = #tpu.dot_dimension_numbers<[1], [0], [0], [1], [0, 0, 1, 1], [], []>} : vector<8x32xf32>, vector<32x128xf32>, vector<8x128xf32> -> vector<8x128xf32>
    %23 = arith.addf %20, %22 : vector<8x128xf32>
    %24 = vector.extract_strided_slice %23 {offsets = [0, 0], sizes = [8, 96], strides = [1, 1]} : vector<8x128xf32> to vector<8x96xf32>
    %25 = arith.negf %24 : vector<8x96xf32>
    %26 = math.exp %25 : vector<8x96xf32>
    %cst_23 = arith.constant 1.000000e+00 : f32
    %27 = vector.broadcast %cst_23 : f32 to vector<8x96xf32>
    %28 = arith.addf %27, %26 : vector<8x96xf32>
    %29 = arith.divf %27, %28 : vector<8x96xf32>
    %30 = vector.extract_strided_slice %23 {offsets = [0, 96], sizes = [8, 32], strides = [1, 1]} : vector<8x128xf32> to vector<8x32xf32>
    %31 = math.tanh %30 : vector<8x32xf32>
    %32 = vector.extract_strided_slice %29 {offsets = [0, 0], sizes = [8, 32], strides = [1, 1]} : vector<8x96xf32> to vector<8x32xf32>
    %33 = vector.extract_strided_slice %29 {offsets = [0, 32], sizes = [8, 32], strides = [1, 1]} : vector<8x96xf32> to vector<8x32xf32>
    %34 = vector.extract_strided_slice %29 {offsets = [0, 64], sizes = [8, 32], strides = [1, 1]} : vector<8x96xf32> to vector<8x32xf32>
    %c0_24 = arith.constant 0 : index
    %c0_25 = arith.constant 0 : index
    %35 = vector.load %arg8[%c0_24, %c0_25] : memref<8x32xf32, #tpu.memory_space<vmem>>, vector<8x32xf32>
    %36 = arith.mulf %33, %35 : vector<8x32xf32>
    %37 = arith.mulf %32, %31 : vector<8x32xf32>
    %38 = arith.addf %36, %37 : vector<8x32xf32>
    %39 = math.tanh %38 : vector<8x32xf32>
    %40 = arith.mulf %34, %39 : vector<8x32xf32>
    %c0_26 = arith.constant 0 : index
    %c0_27 = arith.constant 0 : index
    %41 = vector.load %arg8[%c0_26, %c0_27] : memref<8x32xf32, #tpu.memory_space<vmem>>, vector<8x32xf32>
    tpu.vector_store %arg8[%c0_26, %c0_27], %38 {strides = array<i32>} : memref<8x32xf32, #tpu.memory_space<vmem>>, vector<8x32xf32>,
    %c0_28 = arith.constant 0 : index
    %c0_29 = arith.constant 0 : index
    %42 = vector.load %arg7[%c0_28, %c0_29] : memref<8x32xf32, #tpu.memory_space<vmem>>, vector<8x32xf32>
    tpu.vector_store %arg7[%c0_28, %c0_29], %40 {strides = array<i32>} : memref<8x32xf32, #tpu.memory_space<vmem>>, vector<8x32xf32>,
    %c8_i32_30 = arith.constant 8 : i32
    %43 = arith.muli %17, %c8_i32_30 : i32
    %44 = arith.index_cast %43 : i32 to index
    %c0_31 = arith.constant 0 : index
    %45 = vector.load %arg4[%44, %c0_31] : memref<8x32xf32, #tpu.memory_space<vmem>>, vector<8x32xf32>
    tpu.vector_store %arg4[%44, %c0_31], %40 {strides = array<i32>} : memref<8x32xf32, #tpu.memory_space<vmem>>, vector<8x32xf32>,
    %c1_i32_32 = arith.constant 1 : i32
    %c0_33 = arith.constant 0 : index
    %c0_34 = arith.constant 0 : index
    %46 = vector.load %arg8[%c0_33, %c0_34] : memref<8x32xf32, #tpu.memory_space<vmem>>, vector<8x32xf32>
    %c0_35 = arith.constant 0 : index
    %c0_36 = arith.constant 0 : index
    %47 = vector.load %arg5[%c0_35, %c0_36] : memref<8x32xf32, #tpu.memory_space<vmem>>, vector<8x32xf32>
    tpu.vector_store %arg5[%c0_35, %c0_36], %46 {strides = array<i32>} : memref<8x32xf32, #tpu.memory_space<vmem>>, vector<8x32xf32>,
    return
  }
}

</mosaic_0001>

<bundles_post_ra>
// kernel: tpu_custom_call.1
= control target key start
LH: loop header
LB: loop body
LE: loop exit
PB: predicated region body
PF: predicated region fallthrough
CT: control target
= control target key end

     0   :  { %11 = vsyncpa [#allocation6], 0  ;;  %s517_s0 = inlined_call_operand.hbm [shape: f32[8,16], index: 0, kind: input, shape index: {}]   ;;  %s518_s1 = inlined_call_operand.hbm [shape: f32[8,32], index: 1, kind: input, shape index: {}]   ;;  %s519_s2 = inlined_call_operand.hbm [shape: f32[8,32], index: 2, kind: input, shape index: {}]   ;;  %s520_s3 = inlined_call_operand.hbm [shape: f32[184,128], index: 3, kind: input, shape index: {}]   ;;  %s521_s4 = inlined_call_operand.hbm [shape: f32[8,32], index: 4, kind: output, shape index: {0}]   ;;  %s522_s5 = inlined_call_operand.hbm [shape: f32[8,32], index: 5, kind: output, shape index: {1}]  }
   0x1   :  { %12 = vsyncpa [#allocation9], 0 }
   0x2   :  { %13 = vsyncpa [#allocation12], 0 }
   0x3   :  { %14 = vsyncpa [#allocation7], 0  ;;  %s32_s20 = sshll.u32 %s518_s1, 4  ;;  %s33_s20 = int_to_ptr.hbm [resolvable:$true] %s32_s20 }
   0x4   :  { %15 = vsyncpa [#allocation15], 0  ;;  %s447_s21 = smov [#allocation8]   ;;  %s21_s25 = sshll.u32 %s517_s0, 4  ;;  %s22_s25 = int_to_ptr.hbm [resolvable:$true] %s21_s25 }
   0x5   :  { %s34_s22 = sshll.u32 %s447_s21, 4  ;;  %s448_s26 = smov [#allocation5]   ;;  %s35_s22 = int_to_ptr.vmem [resolvable:$true] %s34_s22 }
   0x6   :  { %37 = dma.hbm_to_vmem [thread:$0]  %s33_s20, 128, %s35_s22, [#allocation9]  }
   0x7   :  { %s23_s27 = sshll.u32 %s448_s26, 4  ;;  %s43_s30 = sshll.u32 %s519_s2, 4  ;;  %s24_s27 = int_to_ptr.vmem [resolvable:$true] %s23_s27  ;;  %s44_s30 = int_to_ptr.hbm [resolvable:$true] %s43_s30 }
   0x8   :  { %26 = dma.hbm_to_vmem [thread:$0]  %s22_s25, 128, %s24_s27, [#allocation6]  }
   0x9   :  { %s53_s7 = sshll.u32 %s520_s3, 4  ;;  %s449_s8 = smov [#allocation10]   ;;  %s54_s7 = int_to_ptr.hbm [resolvable:$true] %s53_s7 }
   0xa   :  { %s45_s9 = sshll.u32 %s449_s8, 4  ;;  %s450_s0 = smov [#allocation11]   ;;  %s46_s9 = int_to_ptr.vmem [resolvable:$true] %s45_s9 }
   0xb   :  { %48 = dma.hbm_to_vmem [thread:$0]  %s44_s30, 128, %s46_s9, [#allocation9]  }
   0xc   :  { %s55_s10 = sshll.u32 %s450_s0, 4  ;;  %s451_s11 = smov 128   ;;  %s56_s10 = int_to_ptr.vmem [resolvable:$true] %s55_s10 }
   0xd   :  { %s452_s12 = smov 8  }
   0xe   :  { %61 = dma.hbm_to_vmem [thread:$0]  %s54_s7, 2944, %s56_s10, [#allocation12], %s451_s11, %s451_s11, %s452_s12  }
   0xf   :  { %437 = dma.done.wait [#allocation6], 128  }
  0x10   :  { %438 = vsyncadd [#allocation6], 4294967168 }
  0x11   :  { %439 = dma.done.wait [#allocation9], 256  }
  0x12   :  { %440 = vsyncadd [#allocation9], 4294967040 }
  0x13   :  { %441 = dma.done.wait [#allocation12], 2944  }
  0x14   :  { %442 = vsyncadd [#allocation12], 4294964352  ;;  %v80_v0 = vld [vmem:[#allocation11 + $0x8] sm:$0xff]  ;;  %v79_v1 = vld [vmem:[#allocation11] sm:$0xff]  ;;  %vm83_vm0 = vcmask 130048   ;;  %vm150_vm1 = vcmask 261120  }
  0x15   :  { %101 = vmatpush.msra.mxu0 %v80_v0  ;;  %v78_v2 = vld [vmem:[#allocation5] sm:$0xff]  ;;  %v123_v3 = vld [vmem:[#allocation11 + $0x90] sm:$0xff]  ;;  %v121_v5 = vld [vmem:[#allocation11 + $0x80] sm:$0xff]  ;;  %s453_s2 = smov 32   ;;  %s454_s3 = smov 96  }
  0x16   :  { %v122_v4 = vld [vmem:[#allocation11 + $0x88] sm:$0xff]  ;;  %124 = vmatpush.msra.mxu1 %v123_v3  ;;  %v148_v6 = vld [vmem:[#allocation11 + $0xb0] sm:$0xff]  ;;  %v120_v7 = vld [vmem:[#allocation11 + $0x78] sm:$0xff]  ;;  %s455_s13 = smov [#allocation14]   ;;  %s253_s17 = sshll.u32 %s522_s5, 4  ;;  %s254_s17 = int_to_ptr.hbm [resolvable:$true] %s253_s17 }
  0x17   :  { %102 = vmatpush.msra.mxu0 %v79_v1  ;;  %171 = vmatpush.msra.mxu2 %v148_v6  ;;  %v147_v8 = vld [vmem:[#allocation11 + $0xa8] sm:$0xff]  ;;  %v146_v9 = vld [vmem:[#allocation11 + $0xa0] sm:$0xff]  ;;  %v149_v10 = vld [vmem:[#allocation8] sm:$0xff]  ;;  %s251_s14 = sshll.u32 %s455_s13, 4  ;;  %s456_s18 = smov 64   ;;  %s252_s14 = int_to_ptr.vmem [resolvable:$true] %s251_s14 }
  0x18   :  { %270 = vmatmul.msk.f32.vlgmr.msra.gmra.mxu0 %vm83_vm0, %v78_v2  ;;  %125 = vmatpush.msra.mxu1 %v122_v4  ;;  %v119_v11 = vld [vmem:[#allocation11 + $0x70] sm:$0xff]  ;;  %151 = vst.msk [vmem:[#allocation3] sm:$0xff] %vm150_vm1, %v149_v10  ;;  %v152_v12 = vld [vmem:[#allocation10] sm:$0xff]  ;;  %v118_v14 = vld [vmem:[#allocation11 + $0x68] sm:$0xff]  ;;  %s457_s19 = smov [#allocation13]   ;;  %s242_s23 = sshll.u32 %s521_s4, 4  ;;  %s243_s23 = int_to_ptr.hbm [resolvable:$true] %s242_s23 }
  0x19   :  { %172 = vmatpush.msra.mxu2 %v147_v8  ;;  %v145_v13 = vld [vmem:[#allocation11 + $0x98] sm:$0xff]  ;;  %153 = vst.msk [vmem:[#allocation4] sm:$0xff] %vm150_vm1, %v152_v12  ;;  %v117_v15 = vld [vmem:[#allocation11 + $0x60] sm:$0xff]  ;;  %v115_v18 = vld [vmem:[#allocation11 + $0x50] sm:$0xff]  ;;  %s240_s20 = sshll.u32 %s457_s19, 4  ;;  %s241_s20 = int_to_ptr.vmem [resolvable:$true] %s240_s20 }
  0x1a   :  { %126 = vmatpush.msra.mxu1 %v121_v5  ;;  %v116_v16 = vld [vmem:[#allocation11 + $0x58] sm:$0xff]  ;;  %v114_v19 = vld [vmem:[#allocation11 + $0x48] sm:$0xff]  ;;  %v113_v20 = vld [vmem:[#allocation11 + $0x40] sm:$0xff] }
  0x1b   :  { %173 = vmatpush.msra.mxu2 %v146_v9  ;;  %v112_v21 = vld [vmem:[#allocation11 + $0x38] sm:$0xff]  ;;  %v111_v22 = vld [vmem:[#allocation11 + $0x30] sm:$0xff]  ;;  %v110_v23 = vld [vmem:[#allocation11 + $0x28] sm:$0xff] }
  0x1c   :  { %127 = vmatpush.msra.mxu1 %v120_v7  ;;  %v109_v24 = vld [vmem:[#allocation11 + $0x20] sm:$0xff]  ;;  %v108_v25 = vld [vmem:[#allocation11 + $0x18] sm:$0xff]  ;;  %v284_v26 = vld [vmem:[#allocation11 + $0x10] ss:$0 sm:$0xff] }
  0x1d   :  { %174 = vmatpush.msra.mxu2 %v145_v13 }
  0x1e   :  { %128 = vmatpush.msra.mxu1 %v119_v11 }
  0x1f   :  { %v155_v17 = vld [vmem:[#allocation3] sm:$0xff] }
  0x20   :  { %129 = vmatpush.msra.mxu1 %v118_v14  ;;  %271 = vmatmul.msk.f32.vlgmr.msra.gmra.mxu2 %vm150_vm1, %v155_v17  ;;  %v200_v34 = vld [vmem:[#allocation4] sm:$0xff] }
  0x22   :  { %130 = vmatpush.msra.mxu1 %v117_v15 }
  0x24   :  { %131 = vmatpush.msra.mxu1 %v116_v16 }
  0x26   :  { %132 = vmatpush.msra.mxu1 %v115_v18 }
  0x28   :  { %133 = vmatpush.msra.mxu1 %v114_v19 }
  0x2a   :  { %134 = vmatpush.msra.mxu1 %v113_v20 }
  0x2c   :  { %135 = vmatpush.msra.mxu1 %v112_v21 }
  0x2e   :  { %136 = vmatpush.msra.mxu1 %v111_v22 }
  0x30   :  { %137 = vmatpush.msra.mxu1 %v110_v23 }
  0x32   :  { %138 = vmatpush.msra.mxu1 %v109_v24 }
  0x34   :  { %139 = vmatpush.msra.mxu1 %v108_v25 }
  0x95   :  { %v104_v27 = vpop.f32.mrf.mxu0 }
  0x96   :  { %v105_v28 = vadd.f32 %v284_v26, %v104_v27 }
  0x98   :  { %v107_v29 = vmax.f32 %v105_v28, 0.0 }
  0x9a   :  { %140 = vmatmul.f32.vlgmr.msra.gmra.mxu1 %v107_v29 }
  0xa3   :  { %v176_v30 = vpop.f32.mrf.mxu2 }
 0x117   :  { %v141_v31 = vpop.f32.mrf.mxu1 }
 0x118   :  { %v179_v32 = vadd.f32 %v176_v30, %v141_v31 }
 0x11a   :  { %285 = vtanh.f32 %v179_v32  ;;  %v272_v35 = vmul.f32 -1.442695, %v179_v32 }
 0x11c   :  { %287 = vpow2.f32 %v272_v35 }
 0x120   :  { %v286_v33 = vpop.eup %285 }
 0x121   :  { %207 = vrot.lane.b32.xlu0 %v286_v33, %s453_s2 }
 0x122   :  { %v288_v36 = vpop.eup %287 }
 0x123   :  { %v183_v37 = vadd.f32 1.0, %v288_v36 }
 0x125   :  { %289 = vrcp.f32 %v183_v37  ;;  %v195_v43 = vand.u32 2147483648, %v183_v37  ;;  %vm189_vm3 = vweird.f32 %v183_v37  ;;  %v193_v44 = vand.u32 2147483647, %v183_v37 }
 0x127   :  { %v196_v46 = vor.u32 1.1754944e-38, %v195_v43  ;;  %vm194_vm5 = vcmp.eq.f32.partialorder %v193_v44, 8.507059e+37 }
 0x129   :  { %202 = vrot.lane.b32.xlu0 %v200_v34, %s453_s2 }
 0x12b   :  { %v290_v38 = vpop.eup %289 }
 0x12c   :  { %v185_v39 = vmul.f32 %v290_v38, %v183_v37  ;;  %vm190_vm2 = vweird.f32 %v290_v38 }
 0x12d   :  { %vm191_vm4 = vmor %vm189_vm3, %vm190_vm2 }
 0x12e   :  { %v186_v40 = vsub.f32 1.0, %v185_v39 }
 0x130   :  { %v187_v41 = vmul.f32 %v290_v38, %v186_v40 }
 0x132   :  { %v188_v42 = vadd.f32 %v290_v38, %v187_v41 }
 0x134   :  { %v192_v45 = vsel %vm191_vm4, %v290_v38, %v188_v42 }
 0x135   :  { %v197_v48 = vsel %vm194_vm5, %v196_v46, %v192_v45 }
 0x193   :  { %v208_v47 = vpop.permute.xlu0 %207 }
 0x194   :  { %v210_v49 = vmul.f32 %v208_v47, %v197_v48 }
 0x196   :  { %212 = vrot.lane.b32.xlu1 %v210_v49, %s453_s2 }
 0x19b   :  { %v203_v50 = vpop.permute.xlu0 %202 }
 0x19c   :  { %v205_v51 = vmul.f32 %v203_v50, %v197_v48 }
 0x208   :  { %v213_v52 = vpop.permute.xlu1 %212 }
 0x209   :  { %v215_v53 = vadd.f32 %v213_v52, %v205_v51 }
 0x20b   :  { %291 = vtanh.f32 %v215_v53  ;;  %223 = vrot.lane.b32.xlu2 %v215_v53, %s454_s3 }
 0x211   :  { %v292_v54 = vpop.eup %291 }
 0x212   :  { %218 = vrot.lane.b32.xlu1 %v292_v54, %s453_s2 }
 0x265   :  { %v224_v55 = vpop.permute.xlu2 %223 }
 0x266   :  { %226 = vst.msk [vmem:[#allocation4] sm:$0xff] %vm150_vm1, %v224_v55 }
 0x26d   :  { %v233_v56 = vld [vmem:[#allocation4] sm:$0xff] }
 0x26e   :  { %234 = vst.msk [vmem:[#allocation14] sm:$0xff] %vm150_vm1, %v233_v56 }
 0x26f   :  { %256 = dma.vmem_to_hbm [thread:$0]  %s252_s14, 128, %s254_s17, [#allocation15]  }
 0x284   :  { %v219_v57 = vpop.permute.xlu1 %218 }
 0x285   :  { %v221_v58 = vmul.f32 %v219_v57, %v197_v48 }
 0x287   :  { %228 = vrot.lane.b32.xlu2 %v221_v58, %s456_s18 }
 0x2e1   :  { %v229_v59 = vpop.permute.xlu2 %228 }
 0x2e2   :  { %231 = vst.msk [vmem:[#allocation3] sm:$0xff] %vm150_vm1, %v229_v59 }
 0x2e3   :  { %232 = vst.msk [vmem:[#allocation13] sm:$0xff] %vm150_vm1, %v229_v59 }
 0x2e4   :  { %245 = dma.vmem_to_hbm [thread:$0]  %s241_s20, 128, %s243_s23, [#allocation7]  }
 0x2e5   :  { %443 = dma.done.wait [#allocation7], 128  }
 0x2e6   :  { %444 = vsyncadd [#allocation7], 4294967168 }
 0x2e7   :  { %445 = dma.done.wait [#allocation15], 128  }
 0x2e8   :  { %446 = vsyncadd [#allocation15], 4294967168 }
 0x2e9   :  { %265 = vsyncpa [#allocation6], 1 }
 0x2ea   :  { %266 = vsyncpa [#allocation9], 1 }
 0x2eb   :  { %267 = vsyncpa [#allocation12], 1 }
 0x2ec   :  { %268 = vsyncpa [#allocation7], 1 }
 0x2ed   :  { %269 = vsyncpa [#allocation15], 1 }

</bundles_post_ra>
